<compile_context>
chip_gen: v5e
topology: v5e:2x2
jax: 0.10.0
libtpu: 0.0.40
codegen_flags: <defaults>
</compile_context>

<pallas_src>
import jax
import jax.numpy as jnp
from jax import lax
from jax.experimental import pallas as pl
from jax.experimental.pallas import tpu as pltpu


def pooler_kernel(x_ref, w_ref, b_ref, o_ref):
    # x_ref: (TM, H)  token tile (possibly bf16)
    # w_ref: (H, H)   weight in PyTorch layout (out x in), VMEM-resident
    # b_ref: (1, H)   bias, f32, VMEM-resident
    # o_ref: (TM, H)  output tile
    x = x_ref[...]
    w = w_ref[...]
    # y = x @ W^T : contract x's last axis with w's last axis (MXU-native, no transpose copy)
    y = lax.dot_general(
        x, w,
        dimension_numbers=(((1,), (1,)), ((), ())),
        preferred_element_type=jnp.float32,
    )
    # Epilogue in f32 (MXU accumulator is already f32; keeps v5e happy with bf16 inputs).
    y = y + b_ref[...].astype(jnp.float32)
    o_ref[...] = jnp.tanh(y).astype(o_ref.dtype)


def _round_up(a, b):
    return (a + b - 1) // b * b


def pooler_forward(hidden_states, weight, bias, *, tm_max=512, compute_dtype=None):
    """Pooler forward: tanh(hidden_states @ weight.T + bias).

    hidden_states: (..., H)
    weight:        (H, H)  PyTorch nn.Linear layout (out_features x in_features)
    bias:          (H,)
    compute_dtype: optional dtype (e.g. jnp.bfloat16) for the matmul operands;
                   accumulation / epilogue stay f32, output keeps the input dtype.
    """
    H = weight.shape[0]
    orig_shape = hidden_states.shape
    out_dtype = hidden_states.dtype

    x2d = hidden_states.reshape(-1, H)
    M = x2d.shape[0]

    if compute_dtype is not None:
        x2d = x2d.astype(compute_dtype)
        weight = weight.astype(compute_dtype)
    b2d = bias.reshape(1, H).astype(jnp.float32)

    # Token tile: multiple of 8 sublanes, capped so VMEM stays bounded independent of M.
    TM = min(tm_max, _round_up(M, 8))
    M_pad = _round_up(M, TM)
    if M_pad != M:
        x2d = jnp.pad(x2d, ((0, M_pad - M), (0, 0)))

    grid = (M_pad // TM,)

    itemsize_in = jnp.dtype(x2d.dtype).itemsize
    itemsize_w = jnp.dtype(weight.dtype).itemsize
    itemsize_out = jnp.dtype(out_dtype).itemsize
    cost = pl.CostEstimate(
        flops=2 * M_pad * H * H,
        transcendentals=M_pad * H,
        bytes_accessed=(M_pad * H * itemsize_in          # x
                        + H * H * itemsize_w             # weight
                        + H * 4                          # bias
                        + M_pad * H * itemsize_out),     # out
    )

    out = pl.pallas_call(
        pooler_kernel,
        out_shape=jax.ShapeDtypeStruct((M_pad, H), out_dtype),
        grid_spec=pltpu.PrefetchScalarGridSpec(
            num_scalar_prefetch=0,
            grid=grid,
            in_specs=[
                pl.BlockSpec((TM, H), lambda i: (i, 0)),   # x tile, pipelined over M
                pl.BlockSpec((H, H), lambda i: (0, 0)),    # weight, VMEM-resident
                pl.BlockSpec((1, H), lambda i: (0, 0)),    # bias, VMEM-resident
            ],
            out_specs=pl.BlockSpec((TM, H), lambda i: (i, 0)),
        ),
        compiler_params=pltpu.CompilerParams(
            dimension_semantics=("parallel",),
        ),
        cost_estimate=cost,
    )(x2d, weight, b2d)

    if M_pad != M:
        out = out[:M]
    return out.reshape(orig_shape)


if __name__ == "__main__":
    batch, seq, hidden = 2, 8, 32

    key = jax.random.PRNGKey(0)
    k_x, k_w, k_b = jax.random.split(key, 3)

    # Deterministic synthetic parameters (shapes match nn.Linear(hidden, hidden))
    hidden_states = jax.random.normal(k_x, (batch, seq, hidden), dtype=jnp.float32)
    weight = jax.random.normal(k_w, (hidden, hidden), dtype=jnp.float32) * (1.0 / jnp.sqrt(hidden))
    bias = jax.random.normal(k_b, (hidden,), dtype=jnp.float32) * 0.01

    ref = jnp.tanh(hidden_states @ weight.T + bias)

    # f32 path (exact semantics vs PyTorch reference)
    out = pooler_forward(hidden_states, weight, bias)
    out = jax.block_until_ready(out)
    assert out.shape == (batch, seq, hidden)
    assert jnp.allclose(out, ref, atol=1e-5, rtol=1e-5)

    # bf16-operand path (f32 accumulate + epilogue) — looser tolerance
    out_bf16 = pooler_forward(hidden_states, weight, bias, compute_dtype=jnp.bfloat16)
    out_bf16 = jax.block_until_ready(out_bf16)
    assert out_bf16.dtype == jnp.float32
    assert jnp.allclose(out_bf16, ref, atol=2e-2, rtol=2e-2)

    # Non-tile-aligned token count (exercises padding + slice-off path)
    hs_odd = jax.random.normal(k_x, (3, 5, hidden), dtype=jnp.float32)
    out_odd = jax.block_until_ready(pooler_forward(hs_odd, weight, bias))
    ref_odd = jnp.tanh(hs_odd @ weight.T + bias)
    assert jnp.allclose(out_odd, ref_odd, atol=1e-5, rtol=1e-5)

    print("KERNEL_OK")
</pallas_src>

<mosaic_0001>
module attributes {stable_mosaic.version = 11 : i64} {
  func.func @pooler_kernel(%arg0: i32, %arg1: memref<16x32xf32, #tpu.memory_space<vmem>>, %arg2: memref<32x32xf32, #tpu.memory_space<vmem>>, %arg3: memref<1x32xf32, #tpu.memory_space<vmem>>, %arg4: memref<16x32xf32, #tpu.memory_space<vmem>>) attributes {dimension_semantics = [#tpu.dimension_semantics<parallel>], iteration_bounds = array<i64: 1>, scalar_prefetch = 0 : i64, scratch_operands = 0 : i64, tpu.core_type = #tpu.core_type<tc>, window_params = [{transform_indices = @transform_0, window_bounds = array<i64: 16, 32>}, {pipeline_mode = #tpu.pipeline_mode<synchronous>, transform_indices = @transform_1, window_bounds = array<i64: 32, 32>}, {pipeline_mode = #tpu.pipeline_mode<synchronous>, transform_indices = @transform_2, window_bounds = array<i64: 1, 32>}, {transform_indices = @transform_3, window_bounds = array<i64: 16, 32>}]} {
    %c0 = arith.constant 0 : index
    %c0_0 = arith.constant 0 : index
    %0 = vector.load %arg1[%c0, %c0_0] : memref<16x32xf32, #tpu.memory_space<vmem>>, vector<16x32xf32>
    %c0_1 = arith.constant 0 : index
    %c0_2 = arith.constant 0 : index
    %1 = vector.load %arg2[%c0_1, %c0_2] : memref<32x32xf32, #tpu.memory_space<vmem>>, vector<32x32xf32>
    %cst = arith.constant dense<0.000000e+00> : vector<16x32xf32>
    %2 = tpu.matmul %0, %1, %cst {dimension_numbers = #tpu.dot_dimension_numbers<[1], [1], [0], [0], [0, 0, 1, 0], [], []>} : vector<16x32xf32>, vector<32x32xf32>, vector<16x32xf32> -> vector<16x32xf32>
    %c0_3 = arith.constant 0 : index
    %c0_4 = arith.constant 0 : index
    %3 = vector.load %arg3[%c0_3, %c0_4] : memref<1x32xf32, #tpu.memory_space<vmem>>, vector<1x32xf32>
    %4 = vector.broadcast %3 : vector<1x32xf32> to vector<16x32xf32>
    %5 = arith.addf %2, %4 : vector<16x32xf32>
    %6 = math.tanh %5 : vector<16x32xf32>
    %c0_5 = arith.constant 0 : index
    %c0_6 = arith.constant 0 : index
    %7 = vector.load %arg4[%c0_5, %c0_6] : memref<16x32xf32, #tpu.memory_space<vmem>>, vector<16x32xf32>
    tpu.vector_store %arg4[%c0_5, %c0_6], %6 {strides = array<i32>} : memref<16x32xf32, #tpu.memory_space<vmem>>, vector<16x32xf32>,
    return
  }
  func.func @transform_0(%arg0: i32) -> (i32, i32) {
    %c0_i32 = arith.constant 0 : i32
    %c0_i32_0 = arith.constant 0 : i32
    return %arg0, %c0_i32 : i32, i32
  }
  func.func @transform_1(%arg0: i32) -> (i32, i32) {
    %c0_i32 = arith.constant 0 : i32
    %c0_i32_0 = arith.constant 0 : i32
    %c0_i32_1 = arith.constant 0 : i32
    return %c0_i32, %c0_i32_0 : i32, i32
  }
  func.func @transform_2(%arg0: i32) -> (i32, i32) {
    %c0_i32 = arith.constant 0 : i32
    %c0_i32_0 = arith.constant 0 : i32
    %c0_i32_1 = arith.constant 0 : i32
    return %c0_i32, %c0_i32_0 : i32, i32
  }
  func.func @transform_3(%arg0: i32) -> (i32, i32) {
    %c0_i32 = arith.constant 0 : i32
    %c0_i32_0 = arith.constant 0 : i32
    return %arg0, %c0_i32 : i32, i32
  }
}

</mosaic_0001>

<bundles_post_ra>
// kernel: tpu_custom_call.1
= control target key start
LH: loop header
LB: loop body
LE: loop exit
PB: predicated region body
PF: predicated region fallthrough
CT: control target
= control target key end

     0   :  { %8 = vsyncpa [#allocation3], 0  ;;  %s279_s0 = inlined_call_operand.hbm [shape: f32[16,32], index: 0, kind: input, shape index: {}]   ;;  %s280_s1 = inlined_call_operand.hbm [shape: f32[32,32], index: 1, kind: input, shape index: {}]   ;;  %s281_s2 = inlined_call_operand.vmem [shape: f32[1,32], index: 2, kind: input, shape index: {}]   ;;  %s282_s3 = inlined_call_operand.hbm [shape: f32[16,32], index: 3, kind: output, shape index: {}]  }
   0x1   :  { %9 = vsyncpa [#allocation6], 0 }
   0x2   :  { %10 = vsyncpa [#allocation4], 0  ;;  %s15_s14 = sshll.u32 %s279_s0, 4  ;;  %s221_s15 = smov [#allocation2]   ;;  %s16_s14 = int_to_ptr.hbm [resolvable:$true] %s15_s14 }
   0x3   :  { %s17_s16 = sshll.u32 %s221_s15, 4  ;;  %s28_s19 = sshll.u32 %s280_s1, 4  ;;  %s18_s16 = int_to_ptr.vmem [resolvable:$true] %s17_s16  ;;  %s29_s19 = int_to_ptr.hbm [resolvable:$true] %s28_s19 }
   0x4   :  { %s222_s20 = smov 128   ;;  %s223_s21 = smov 8  }
   0x5   :  { %23 = dma.hbm_to_vmem [thread:$0]  %s16_s14, 256, %s18_s16, [#allocation3], %s222_s20, %s222_s20, %s223_s21  }
   0x6   :  { %s224_s22 = smov [#allocation5]  }
   0x7   :  { %s30_s23 = sshll.u32 %s224_s22, 4  ;;  %s31_s23 = int_to_ptr.vmem [resolvable:$true] %s30_s23 }
   0x8   :  { %36 = dma.hbm_to_vmem [thread:$0]  %s29_s19, 512, %s31_s23, [#allocation6], %s222_s20, %s222_s20, %s223_s21  }
   0x9   :  { %215 = dma.done.wait [#allocation3], 256  }
   0xa   :  { %216 = vsyncadd [#allocation3], 4294967040 }
   0xb   :  { %217 = dma.done.wait [#allocation6], 512  }
   0xc   :  { %218 = vsyncadd [#allocation6], 4294966784  ;;  %vm57_vm0 = vcmask 261120   ;;  %v52_v0 = vld [vmem:[#allocation5 + $0x18] sm:$0xff]  ;;  %v51_v1 = vld [vmem:[#allocation5 + $0x10] sm:$0xff]  ;;  %s225_s24 = smov [#allocation7]  }
   0xd   :  { %123 = vmatpush.xpose.msk.msra.mxu0 %vm57_vm0, %v52_v0  ;;  %129 = vmatpush.xpose.msk.msra.mxu1 %vm57_vm0, %v52_v0  ;;  %v50_v2 = vld [vmem:[#allocation5 + $0x8] sm:$0xff]  ;;  %v49_v3 = vld [vmem:[#allocation5] sm:$0xff]  ;;  %v47_v4 = vld [vmem:[#allocation2] sm:$0xff]  ;;  %s107_s25 = sshll.u32 %s225_s24, 4  ;;  %s109_s28 = sshll.u32 %s282_s3, 4  ;;  %s108_s25 = int_to_ptr.vmem [resolvable:$true] %s107_s25  ;;  %s110_s28 = int_to_ptr.hbm [resolvable:$true] %s109_s28 }
   0xe   :  { %v48_v5 = vld [vmem:[#allocation2 + $0x8] sm:$0xff]  ;;  %v138_v6 = vld [vmem:[%s281_s2] ss:$0 sm:$0xff] }
  0x11   :  { %124 = vmatpush.xpose.msk.msra.mxu0 %vm57_vm0, %v51_v1  ;;  %130 = vmatpush.xpose.msk.msra.mxu1 %vm57_vm0, %v51_v1 }
  0x15   :  { %125 = vmatpush.xpose.msk.msra.mxu0 %vm57_vm0, %v50_v2  ;;  %131 = vmatpush.xpose.msk.msra.mxu1 %vm57_vm0, %v50_v2 }
  0x19   :  { %126 = vmatpush.xpose.msk.msra.mxu0 %vm57_vm0, %v49_v3  ;;  %132 = vmatpush.xpose.msk.msra.mxu1 %vm57_vm0, %v49_v3 }
  0x1c   :  { %127 = vmatmul.msk.f32.vlgmr.msra.gmra.mxu0 %vm57_vm0, %v47_v4  ;;  %128 = vmatmul.msk.f32.vlgmr.msra.gmra.mxu1 %vm57_vm0, %v48_v5 }
  0x99   :  { %v93_v7 = vpop.f32.mrf.mxu0  ;;  %v96_v8 = vpop.f32.mrf.mxu1 }
  0x9a   :  { %v94_v9 = vadd.f32 %v138_v6, %v93_v7  ;;  %v97_v10 = vadd.f32 %v138_v6, %v96_v8 }
  0x9c   :  { %139 = vtanh.f32 %v94_v9 }
  0x9d   :  { %141 = vtanh.f32 %v97_v10 }
  0xa2   :  { %v140_v11 = vpop.eup %139 }
  0xa3   :  { %v142_v12 = vpop.eup %141  ;;  %101 = vst.msk [vmem:[#allocation7] sm:$0xff] %vm57_vm0, %v140_v11 }
  0xa4   :  { %102 = vst.msk [vmem:[#allocation7 + $0x8] sm:$0xff] %vm57_vm0, %v142_v12 }
  0xa5   :  { %115 = dma.vmem_to_hbm [thread:$0]  %s108_s25, 256, %s110_s28, [#allocation4], %s222_s20, %s222_s20, %s223_s21  }
  0xa6   :  { %219 = dma.done.wait [#allocation4], 256  }
  0xa7   :  { %220 = vsyncadd [#allocation4], 4294967040 }
  0xa8   :  { %120 = vsyncpa [#allocation3], 1 }
  0xa9   :  { %121 = vsyncpa [#allocation6], 1 }
  0xaa   :  { %122 = vsyncpa [#allocation4], 1 }

</bundles_post_ra>
